<compile_context>
chip_gen: v7x
topology: tpu7x:2x2x1
jax: 0.10.0
libtpu: 0.0.40
codegen_flags: <defaults>
</compile_context>

<pallas_src>
import jax
import jax.numpy as jnp
from jax.experimental import pallas as pl
from jax.experimental.pallas import tpu as pltpu

SIZE = 75                 # default `size` of the PyTorch module
NOISE = 0.0               # default `noise` of the PyTorch module
LANES = 128               # TPU lane width; feature axis padded to this in-kernel
NUM_FUSED_LAYERS = 5      # 6 Linear layers with L3/L4 folded into one
MAX_TB = 4096             # max batch-tile rows (4096*75*4B = 1.2 MiB per buffer)
TB_QUANTUM = 512          # batch-tile granularity for large batches


def _autoencoder_kernel(x_ref, w_ref, out_ref):
    """Fused 5-matmul MLP forward on one (tb, size) batch tile.

    x_ref:   (tb, size) f32 input rows.
    w_ref:   (128, 5*128) bf16 weight slab.  Layer i's (in,out) weights are
             zero-padded into column block [:, i*128:(i+1)*128]; its bias sits
             in row 127 of that block, and w[127, i*128+127] = 1 so a constant
             1.0 in activation lane 127 carries the folded bias through every
             layer (ReLU(1) == 1, padded lanes stay exactly 0).
    out_ref: (tb, size) f32 output rows.
    """
    tb = x_ref.shape[0]
    size = out_ref.shape[1]

    # In-kernel lane pad size -> 128: zeros for the dead lanes and a 1.0 in the
    # last lane (the folded-bias "ones" lane).  Pure value computation, so it
    # is safe under megacore grid partitioning.
    x = x_ref[...]
    h = jnp.concatenate(
        [x,
         jnp.zeros((tb, LANES - size - 1), x.dtype),
         jnp.ones((tb, 1), x.dtype)],
        axis=-1).astype(jnp.bfloat16)                       # (tb, 128)

    def layer(h, i, relu):
        w = w_ref[:, i * LANES:(i + 1) * LANES]             # static 128-aligned slice (free)
        y = jnp.dot(h, w, preferred_element_type=jnp.float32)  # bf16 x bf16 -> f32 acc
        if relu:
            y = jnp.maximum(y, 0.0)
        return y

    h = layer(h, 0, True).astype(jnp.bfloat16)   # Linear(size,50) + ReLU
    h = layer(h, 1, True).astype(jnp.bfloat16)   # Linear(50,30)   + ReLU
    h = layer(h, 2, True).astype(jnp.bfloat16)   # Linear(30,15) ∘ Linear(15,30) folded, ReLU
    h = layer(h, 3, True).astype(jnp.bfloat16)   # Linear(30,50)   + ReLU
    y = layer(h, 4, False)                       # Linear(50,size), no activation, f32
    out_ref[...] = y[:, :size].astype(out_ref.dtype)


def pack_params(params):
    """Fold L3@L4 (and their biases), fold all biases into weight row 127, and
    pack everything into a single lane-aligned bf16 slab."""
    (w1, b1), (w2, b2), (w3, b3), (w4, b4), (w5, b5), (w6, b6) = params
    # No ReLU between the encoder's last Linear and the decoder's first, so the
    # two compose into one affine map (changes f32 summation order slightly).
    w34 = w3 @ w4              # (30,15) @ (15,30) -> (30,30)
    b34 = b3 @ w4 + b4
    ws = (w1, w2, w34, w5, w6)
    bs = (b1, b2, b34, b5, b6)
    slab = jnp.zeros((LANES, NUM_FUSED_LAYERS * LANES), jnp.float32)
    for i, (w, b) in enumerate(zip(ws, bs)):
        fi, fo = w.shape
        col = i * LANES
        slab = slab.at[:fi, col:col + fo].set(w)
        slab = slab.at[LANES - 1, col:col + fo].set(b)           # folded bias row
        if i < NUM_FUSED_LAYERS - 1:
            slab = slab.at[LANES - 1, col + LANES - 1].set(1.0)  # propagate ones lane
    return slab.astype(jnp.bfloat16)


def _round_up(n, m):
    return -(-n // m) * m


def _pick_batch_tile(batch):
    """Choose the batch-tile row count.

    Big tiles (up to 4096 rows) amortize the ~0.35us fixed per-grid-step cost.
    For batches larger than one quantum, aim for an even grid of >= 2 steps so
    the "parallel" batch axis splits across v7x's two TensorCores (harmless on
    single-TC v5e/v6e)."""
    if batch <= TB_QUANTUM:
        return max(8, _round_up(batch, 8))                   # single small tile
    n_steps = max(2, _round_up(-(-batch // MAX_TB), 2))       # even, >= 2
    tb = _round_up(-(-batch // n_steps), TB_QUANTUM)
    return min(MAX_TB, tb)


@jax.jit
def autoencoder_forward(x, w_slab):
    """x: (B, size) float32.  w_slab: (128, 5*128) bf16 packed weights."""
    batch, size = x.shape
    tb = _pick_batch_tile(batch)
    return pl.pallas_call(
        _autoencoder_kernel,
        out_shape=jax.ShapeDtypeStruct((batch, size), jnp.float32),
        grid=(pl.cdiv(batch, tb),),
        in_specs=[
            # x tile: last block dim == full array extent (75) -> no wrapper pad.
            pl.BlockSpec((tb, size), lambda i: (i, 0)),
            # Weight slab: constant index_map -> stays VMEM-resident across steps.
            pl.BlockSpec((LANES, NUM_FUSED_LAYERS * LANES), lambda i: (0, 0)),
        ],
        # Output written directly at 75 lanes -> no wrapper slice pass.
        out_specs=pl.BlockSpec((tb, size), lambda i: (i, 0)),
        compiler_params=pltpu.CompilerParams(
            dimension_semantics=("parallel",),   # megacore sharding on v7x
            vmem_limit_bytes=32 << 20,
        ),
    )(x, w_slab)


def init_params(key, size=SIZE):
    """Deterministic init mimicking PyTorch Linear default (uniform ±1/sqrt(fan_in)).
    Weights are returned already transposed to (in_features, out_features)."""
    dims_in = (size, 50, 30, 15, 30, 50)
    dims_out = (50, 30, 15, 30, 50, size)
    params = []
    for fan_in, fan_out in zip(dims_in, dims_out):
        key, kw, kb = jax.random.split(key, 3)
        bound = 1.0 / jnp.sqrt(float(fan_in))
        w_t = jax.random.uniform(kw, (fan_in, fan_out), jnp.float32, -bound, bound)
        b = jax.random.uniform(kb, (fan_out,), jnp.float32, -bound, bound)
        params.append((w_t, b))
    return params


def reference_forward(x, params):
    """Pure-JAX f32 reference of the original (unfolded) 6-layer forward pass."""
    h = x
    for i, (w, b) in enumerate(params):
        h = h @ w + b
        if i not in (2, 5):   # no activation after encoder[-1] and decoder[-1]
            h = jnp.maximum(h, 0.0)
    return h


if __name__ == "__main__":
    key = jax.random.PRNGKey(0)
    key, kx, kn = jax.random.split(key, 3)

    B = 8
    x = jax.random.normal(kx, (B, SIZE), jnp.float32)

    # forward(): x = x + noise * randn_like(x).  Skipped when noise == 0 (the
    # module default) — 0*randn is not folded by XLA and would cost an extra
    # randn + full HBM pass over x.
    # TODO(synk): if noise != 0 is needed, generate the Gaussian in-kernel with
    # pltpu.prng_seed + pltpu.prng_random_bits (per-tile seed from program_id)
    # instead of a separate wrapper-side randn + add pass.
    if NOISE != 0.0:
        x = x + NOISE * jax.random.normal(kn, x.shape, jnp.float32)

    params = init_params(key, SIZE)
    w_slab = pack_params(params)

    x_hat = jax.block_until_ready(autoencoder_forward(x, w_slab))
    ref = reference_forward(x, params)
    assert x_hat.shape == (B, SIZE)
    # bf16 matmul operands (f32 accumulation) + the L3/L4 fold change the exact
    # f32 summation, so compare with a correspondingly loose tolerance.
    assert jnp.allclose(x_hat, ref, atol=5e-2, rtol=5e-2), "mismatch vs reference (B=8)"

    # Exercise the multi-step pipelined grid and a partial boundary block
    # (B not a tile multiple): tb=512, grid=2 -> both v7x TensorCores get work.
    B2 = 1000
    x2 = jax.random.normal(jax.random.PRNGKey(1), (B2, SIZE), jnp.float32)
    y2 = jax.block_until_ready(autoencoder_forward(x2, w_slab))
    assert y2.shape == (B2, SIZE)
    assert jnp.allclose(y2, reference_forward(x2, params), atol=5e-2, rtol=5e-2), \
        "mismatch vs reference (B=1000)"

    print("KERNEL_OK")
</pallas_src>

<mosaic_0001>
module attributes {stable_mosaic.version = 11 : i64} {
  func.func @_autoencoder_kernel(%arg0: i32, %arg1: memref<8x75xf32, #tpu.memory_space<vmem>>, %arg2: memref<128x640xbf16, #tpu.memory_space<vmem>>, %arg3: memref<8x75xf32, #tpu.memory_space<vmem>>) attributes {dimension_semantics = [#tpu.dimension_semantics<parallel>], iteration_bounds = array<i64: 1>, scalar_prefetch = 0 : i64, scratch_operands = 0 : i64, tpu.core_type = #tpu.core_type<tc>, window_params = [{transform_indices = @transform_0, window_bounds = array<i64: 8, 75>}, {pipeline_mode = #tpu.pipeline_mode<synchronous>, transform_indices = @transform_1, window_bounds = array<i64: 128, 640>}, {transform_indices = @transform_2, window_bounds = array<i64: 8, 75>}]} {
    %c0 = arith.constant 0 : index
    %c0_0 = arith.constant 0 : index
    %0 = vector.load %arg1[%c0, %c0_0] : memref<8x75xf32, #tpu.memory_space<vmem>>, vector<8x75xf32>
    %cst = arith.constant 0.000000e+00 : f32
    %1 = vector.broadcast %cst : f32 to vector<8x52xf32>
    %cst_1 = arith.constant 1.000000e+00 : f32
    %2 = vector.broadcast %cst_1 : f32 to vector<8x1xf32>
    %3 = tpu.concatenate %0, %1, %2 in 1 : vector<8x75xf32>, vector<8x52xf32>, vector<8x1xf32> -> vector<8x128xf32>
    %4 = arith.truncf %3 : vector<8x128xf32> to vector<8x128xbf16>
    %c0_2 = arith.constant 0 : index
    %c0_3 = arith.constant 0 : index
    %5 = vector.load %arg2[%c0_2, %c0_3] : memref<128x640xbf16, #tpu.memory_space<vmem>>, vector<128x128xbf16>
    %cst_4 = arith.constant dense<0.000000e+00> : vector<8x128xf32>
    %6 = tpu.matmul %4, %5, %cst_4 {dimension_numbers = #tpu.dot_dimension_numbers<[1], [0], [0], [1], [0, 0, 1, 1], [], []>} : vector<8x128xbf16>, vector<128x128xbf16>, vector<8x128xf32> -> vector<8x128xf32>
    %cst_5 = arith.constant 0.000000e+00 : f32
    %7 = vector.broadcast %cst_5 : f32 to vector<8x128xf32>
    %8 = arith.maximumf %6, %7 : vector<8x128xf32>
    %9 = arith.truncf %8 : vector<8x128xf32> to vector<8x128xbf16>
    %c0_6 = arith.constant 0 : index
    %c128 = arith.constant 128 : index
    %10 = vector.load %arg2[%c0_6, %c128] : memref<128x640xbf16, #tpu.memory_space<vmem>>, vector<128x128xbf16>
    %cst_7 = arith.constant dense<0.000000e+00> : vector<8x128xf32>
    %11 = tpu.matmul %9, %10, %cst_7 {dimension_numbers = #tpu.dot_dimension_numbers<[1], [0], [0], [1], [0, 0, 1, 1], [], []>} : vector<8x128xbf16>, vector<128x128xbf16>, vector<8x128xf32> -> vector<8x128xf32>
    %cst_8 = arith.constant 0.000000e+00 : f32
    %12 = vector.broadcast %cst_8 : f32 to vector<8x128xf32>
    %13 = arith.maximumf %11, %12 : vector<8x128xf32>
    %14 = arith.truncf %13 : vector<8x128xf32> to vector<8x128xbf16>
    %c0_9 = arith.constant 0 : index
    %c256 = arith.constant 256 : index
    %15 = vector.load %arg2[%c0_9, %c256] : memref<128x640xbf16, #tpu.memory_space<vmem>>, vector<128x128xbf16>
    %cst_10 = arith.constant dense<0.000000e+00> : vector<8x128xf32>
    %16 = tpu.matmul %14, %15, %cst_10 {dimension_numbers = #tpu.dot_dimension_numbers<[1], [0], [0], [1], [0, 0, 1, 1], [], []>} : vector<8x128xbf16>, vector<128x128xbf16>, vector<8x128xf32> -> vector<8x128xf32>
    %cst_11 = arith.constant 0.000000e+00 : f32
    %17 = vector.broadcast %cst_11 : f32 to vector<8x128xf32>
    %18 = arith.maximumf %16, %17 : vector<8x128xf32>
    %19 = arith.truncf %18 : vector<8x128xf32> to vector<8x128xbf16>
    %c0_12 = arith.constant 0 : index
    %c384 = arith.constant 384 : index
    %20 = vector.load %arg2[%c0_12, %c384] : memref<128x640xbf16, #tpu.memory_space<vmem>>, vector<128x128xbf16>
    %cst_13 = arith.constant dense<0.000000e+00> : vector<8x128xf32>
    %21 = tpu.matmul %19, %20, %cst_13 {dimension_numbers = #tpu.dot_dimension_numbers<[1], [0], [0], [1], [0, 0, 1, 1], [], []>} : vector<8x128xbf16>, vector<128x128xbf16>, vector<8x128xf32> -> vector<8x128xf32>
    %cst_14 = arith.constant 0.000000e+00 : f32
    %22 = vector.broadcast %cst_14 : f32 to vector<8x128xf32>
    %23 = arith.maximumf %21, %22 : vector<8x128xf32>
    %24 = arith.truncf %23 : vector<8x128xf32> to vector<8x128xbf16>
    %c0_15 = arith.constant 0 : index
    %c512 = arith.constant 512 : index
    %25 = vector.load %arg2[%c0_15, %c512] : memref<128x640xbf16, #tpu.memory_space<vmem>>, vector<128x128xbf16>
    %cst_16 = arith.constant dense<0.000000e+00> : vector<8x128xf32>
    %26 = tpu.matmul %24, %25, %cst_16 {dimension_numbers = #tpu.dot_dimension_numbers<[1], [0], [0], [1], [0, 0, 1, 1], [], []>} : vector<8x128xbf16>, vector<128x128xbf16>, vector<8x128xf32> -> vector<8x128xf32>
    %27 = vector.extract_strided_slice %26 {offsets = [0, 0], sizes = [8, 75], strides = [1, 1]} : vector<8x128xf32> to vector<8x75xf32>
    %c0_17 = arith.constant 0 : index
    %c0_18 = arith.constant 0 : index
    %28 = vector.load %arg3[%c0_17, %c0_18] : memref<8x75xf32, #tpu.memory_space<vmem>>, vector<8x75xf32>
    tpu.vector_store %arg3[%c0_17, %c0_18], %27 {strides = array<i32>} : memref<8x75xf32, #tpu.memory_space<vmem>>, vector<8x75xf32>,
    return
  }
  func.func @transform_0(%arg0: i32) -> (i32, i32) {
    %c0_i32 = arith.constant 0 : i32
    %c0_i32_0 = arith.constant 0 : i32
    return %arg0, %c0_i32 : i32, i32
  }
  func.func @transform_1(%arg0: i32) -> (i32, i32) {
    %c0_i32 = arith.constant 0 : i32
    %c0_i32_0 = arith.constant 0 : i32
    %c0_i32_1 = arith.constant 0 : i32
    return %c0_i32, %c0_i32_0 : i32, i32
  }
  func.func @transform_2(%arg0: i32) -> (i32, i32) {
    %c0_i32 = arith.constant 0 : i32
    %c0_i32_0 = arith.constant 0 : i32
    return %arg0, %c0_i32 : i32, i32
  }
}

</mosaic_0001>

<bundles_post_ra>
// kernel: autoencoder_forward.1
= control target key start
LH: loop header
LB: loop body
LE: loop exit
PB: predicated region body
PF: predicated region fallthrough
CT: control target
= control target key end

     0   :  { %7 = vsyncpa [#allocation3], 0  ;;  %s1011_s0 = inlined_call_operand.hbm [shape: f32[8,75], index: 0, kind: input, shape index: {}]   ;;  %s1012_s1 = inlined_call_operand.hbm [shape: bf16[128,640], index: 1, kind: input, shape index: {}]   ;;  %s1013_s2 = inlined_call_operand.hbm [shape: f32[8,75], index: 2, kind: output, shape index: {}]  }
   0x1   :  { %8 = vsyncpa [#allocation6], 0 }
   0x2   :  { %9 = vsyncpa [#allocation4], 0  ;;  %s894_s9 = smov [#allocation2]   ;;  %s895_s11 = smov [#allocation5]  }
   0x3   :  { %s16_s10 = sshll.u32 %s894_s9, 4  ;;  %s25_s12 = sshll.u32 %s895_s11, 4  ;;  %s17_s10 = int_to_ptr.vmem [resolvable:$true] %s16_s10  ;;  %s916_s12 = int_to_ptr.vmem [resolvable:$true] %s25_s12 }
   0x4   :  { %s822_s15 = scalar_lea.hbm %s1011_s0, 128 }
   0x5   :  { %p823_p0 = scmp.ne.s32.totalorder %s1011_s0, %s822_s15  ;;  %p826_p1 = scmp.lt.u32.totalorder %s822_s15, %s1011_s0 }
   0x7   :  { %p828_p2 = pnand %p826_p1, %p823_p0 }
   0x9   :  { %831 = shalt.err (!%p828_p2)
}
   0xa   :  { %s832_s20 = scalar_lea.vmem %s17_s10, 128  ;;  %p837_p4 = scmp.lt.s32.totalorder %s17_s10, %s17_s10 }
   0xb   :  { %p833_p3 = scmp.ne.s32.totalorder %s17_s10, %s832_s20  ;;  %p838_p5 = scmp.lt.s32.totalorder %s832_s20, %s832_s20 }
   0xd   :  { %p839_p6 = por %p838_p5, %p837_p4 }
   0xf   :  { %p840_p7 = pnand %p839_p6, %p833_p3 }
  0x11   :  { %843 = shalt.err (!%p840_p7)
}
  0x12   :  { %19 = dma.hbm_to_vmem [thread:$0]  %s1011_s0, 128, %s17_s10, [#allocation3]  }
  0x13   :  { %s844_s25 = scalar_lea.hbm %s1012_s1, 5120 }
  0x14   :  { %p845_p8 = scmp.ne.s32.totalorder %s1012_s1, %s844_s25  ;;  %p848_p9 = scmp.lt.u32.totalorder %s844_s25, %s1012_s1 }
  0x16   :  { %p850_p10 = pnand %p848_p9, %p845_p8 }
  0x18   :  { %853 = shalt.err (!%p850_p10)
}
  0x19   :  { %s854_s30 = scalar_lea.vmem %s916_s12, 5120  ;;  %p859_p12 = scmp.lt.s32.totalorder %s916_s12, %s916_s12 }
  0x1a   :  { %p855_p11 = scmp.ne.s32.totalorder %s916_s12, %s854_s30  ;;  %p860_p13 = scmp.lt.s32.totalorder %s854_s30, %s854_s30 }
  0x1c   :  { %p861_p0 = por %p860_p13, %p859_p12 }
  0x1e   :  { %p862_p1 = pnand %p861_p0, %p855_p11 }
  0x20   :  { %865 = shalt.err (!%p862_p1)
}
  0x21   :  { %s896_s0 = smov 320   ;;  %s897_s3 = smov 20  }
  0x22   :  { %31 = dma.hbm_to_vmem [thread:$0]  %s1012_s1, 5120, %s916_s12, [#allocation6], %s896_s0, %s896_s0, %s897_s3  }
  0x23   :  { %888 = dma.done.wait [#allocation3], 128  }
  0x24   :  { %889 = vsyncadd [#allocation3], 4294967168 }
  0x25   :  { %890 = dma.done.wait [#allocation6], 5120  }
  0x26   :  { %891 = vsyncadd [#allocation6], 4294962176  ;;  %v898_v0 = vmov 0.0   ;;  %vm899_vm0 = vmmov 0   ;;  %v782_v1 = vld [vmem:[#allocation5] ss:$20 sps:$4 sm:$0xff]  }
  0x27   :  { %675 = vmatprep.subr.bf16.mxu0 %v898_v0  ;;  %691 = vmatprep.mubr.msk.bf16.mxu0 %vm899_vm0, %v898_v0  ;;  %v783_v2 = vld [vmem:[#allocation5 + $0x28] ss:$20 sps:$4 sm:$0xff]   ;;  %v784_v3 = vld [vmem:[#allocation5 + $0x50] ss:$20 sps:$4 sm:$0xff]   ;;  %vm40_vm1 = vcmask 613376   ;;  %vm42_vm2 = vcmask 1039360  }
  0x28   :  { %695 = vmatprep.subr.bf16.mxu1 %v898_v0  ;;  %711 = vmatprep.mubr.msk.bf16.mxu1 %vm899_vm0, %v898_v0  ;;  %v39_v4 = vld [vmem:[#allocation2] sm:$0xff]  ;;  %v791_v8 = vld [vmem:[#allocation5 + $0x2c] ss:$20 sps:$4 sm:$0xff]   ;;  %v792_v11 = vld [vmem:[#allocation5 + $0x54] ss:$20 sps:$4 sm:$0xff]   ;;  %s900_s1 = smov [#allocation7]  }
  0x29   :  { %676 = vmatpush3.bf16.msra.mxu0 %v782_v1  ;;  %v790_v5 = vld [vmem:[#allocation5 + $0x4] ss:$20 sps:$4 sm:$0xff]   ;;  %v41_v7 = vsel %vm40_vm1, %v39_v4, 0.0  ;;  %v786_v9 = vld [vmem:[#allocation5 + $0xa0] ss:$20 sps:$4 sm:$0xff]   ;;  %s580_s6 = sshll.u32 %s900_s1, 4  ;;  %s581_s6 = int_to_ptr.vmem [resolvable:$true] %s580_s6 }
  0x2a   :  { %677 = vmatprep.subr.bf16.mxu0 %v898_v0  ;;  %v785_v6 = vld [vmem:[#allocation5 + $0x78] ss:$20 sps:$4 sm:$0xff]   ;;  %696 = vmatpush3.bf16.msra.mxu1 %v790_v5  ;;  %v43_v10 = vsel %vm42_vm2, %v41_v7, 1.0  ;;  %v787_v12 = vld [vmem:[#allocation5 + $0xc8] ss:$20 sps:$4 sm:$0xff]   ;;  %s866_s7 = scalar_lea.vmem %s581_s6, 128  ;;  %p871_p3 = scmp.lt.s32.totalorder %s581_s6, %s581_s6 }
  0x2b   :  { %697 = vmatprep.subr.bf16.mxu1 %v898_v0  ;;  %v793_v13 = vld [vmem:[#allocation5 + $0x7c] ss:$20 sps:$4 sm:$0xff]   ;;  %v794_v15 = vld [vmem:[#allocation5 + $0xa4] ss:$20 sps:$4 sm:$0xff]   ;;  %v795_v17 = vld [vmem:[#allocation5 + $0xcc] ss:$20 sps:$4 sm:$0xff]   ;;  %v44_v18 = vpack.c.bf16 %v43_v10, %v43_v10  ;;  %p867_p2 = scmp.ne.s32.totalorder %s581_s6, %s866_s7  ;;  %p872_p4 = scmp.lt.s32.totalorder %s866_s7, %s866_s7 }
  0x2c   :  { %v788_v14 = vld [vmem:[#allocation5 + $0xf0] ss:$20 sps:$4 sm:$0xff]   ;;  %v789_v16 = vld [vmem:[#allocation5 + $0x118] ss:$20 sps:$4 sm:$0xff]   ;;  %v796_v19 = vld [vmem:[#allocation5 + $0xf4] ss:$20 sps:$4 sm:$0xff]  }
  0x2d   :  { %678 = vmatpush3.bf16.msra.mxu0 %v783_v2  ;;  %v797_v20 = vld [vmem:[#allocation5 + $0x11c] ss:$20 sps:$4 sm:$0xff]   ;;  %v800_v23 = vld [vmem:[#allocation5 + $0x58] ss:$20 sps:$4 sm:$0xff]   ;;  %v801_v24 = vld [vmem:[#allocation5 + $0x80] ss:$20 sps:$4 sm:$0xff]   ;;  %p873_p5 = por %p872_p4, %p871_p3 }
  0x2e   :  { %679 = vmatprep.subr.bf16.mxu0 %v898_v0  ;;  %698 = vmatpush3.bf16.msra.mxu1 %v791_v8  ;;  %v798_v21 = vld [vmem:[#allocation5 + $0x8] ss:$20 sps:$4 sm:$0xff]   ;;  %v799_v22 = vld [vmem:[#allocation5 + $0x30] ss:$20 sps:$4 sm:$0xff]   ;;  %v804_v27 = vld [vmem:[#allocation5 + $0xf8] ss:$20 sps:$4 sm:$0xff]  }
  0x2f   :  { %699 = vmatprep.subr.bf16.mxu1 %v898_v0  ;;  %v802_v25 = vld [vmem:[#allocation5 + $0xa8] ss:$20 sps:$4 sm:$0xff]   ;;  %v803_v26 = vld [vmem:[#allocation5 + $0xd0] ss:$20 sps:$4 sm:$0xff]   ;;  %v805_v34 = vld [vmem:[#allocation5 + $0x120] ss:$20 sps:$4 sm:$0xff]   ;;  %p874_p6 = pnand %p873_p5, %p867_p2 }
  0x30   :  { %v806_v35 = vld [vmem:[#allocation5 + $0xc] ss:$20 sps:$4 sm:$0xff]   ;;  %v807_v36 = vld [vmem:[#allocation5 + $0x34] ss:$20 sps:$4 sm:$0xff]   ;;  %v808_v37 = vld [vmem:[#allocation5 + $0x5c] ss:$20 sps:$4 sm:$0xff]  }
  0x31   :  { %680 = vmatpush3.bf16.msra.mxu0 %v784_v3  ;;  %v809_v38 = vld [vmem:[#allocation5 + $0x84] ss:$20 sps:$4 sm:$0xff]   ;;  %v810_v39 = vld [vmem:[#allocation5 + $0xac] ss:$20 sps:$4 sm:$0xff]   ;;  %v811_v40 = vld [vmem:[#allocation5 + $0xd4] ss:$20 sps:$4 sm:$0xff]  }
  0x32   :  { %681 = vmatprep.subr.bf16.mxu0 %v898_v0  ;;  %700 = vmatpush3.bf16.msra.mxu1 %v792_v11  ;;  %v812_v41 = vld [vmem:[#allocation5 + $0xfc] ss:$20 sps:$4 sm:$0xff]   ;;  %v813_v48 = vld [vmem:[#allocation5 + $0x124] ss:$20 sps:$4 sm:$0xff]   ;;  %v816_v51 = vld [vmem:[#allocation5 + $0x60] ss:$20 sps:$4 sm:$0xff]  }
  0x33   :  { %701 = vmatprep.subr.bf16.mxu1 %v898_v0  ;;  %v814_v49 = vld [vmem:[#allocation5 + $0x10] ss:$20 sps:$4 sm:$0xff]   ;;  %v815_v50 = vld [vmem:[#allocation5 + $0x38] ss:$20 sps:$4 sm:$0xff]   ;;  %v817_v52 = vld [vmem:[#allocation5 + $0x88] ss:$20 sps:$4 sm:$0xff]  }
  0x34   :  { %v818_v53 = vld [vmem:[#allocation5 + $0xb0] ss:$20 sps:$4 sm:$0xff]   ;;  %v819_v54 = vld [vmem:[#allocation5 + $0xd8] ss:$20 sps:$4 sm:$0xff]   ;;  %v820_v55 = vld [vmem:[#allocation5 + $0x100] ss:$20 sps:$4 sm:$0xff]  }
  0x35   :  { %682 = vmatpush3.bf16.msra.mxu0 %v785_v6  ;;  %v821_v62 = vld [vmem:[#allocation5 + $0x128] ss:$20 sps:$4 sm:$0xff]  }
  0x36   :  { %683 = vmatprep.subr.bf16.mxu0 %v898_v0  ;;  %702 = vmatpush3.bf16.msra.mxu1 %v793_v13 }
  0x37   :  { %703 = vmatprep.subr.bf16.mxu1 %v898_v0 }
  0x39   :  { %684 = vmatpush3.bf16.msra.mxu0 %v786_v9 }
  0x3a   :  { %685 = vmatprep.subr.bf16.mxu0 %v898_v0  ;;  %704 = vmatpush3.bf16.msra.mxu1 %v794_v15 }
  0x3b   :  { %705 = vmatprep.subr.bf16.mxu1 %v898_v0 }
  0x3d   :  { %686 = vmatpush3.bf16.msra.mxu0 %v787_v12 }
  0x3e   :  { %687 = vmatprep.subr.bf16.mxu0 %v898_v0  ;;  %706 = vmatpush3.bf16.msra.mxu1 %v795_v17 }
  0x3f   :  { %707 = vmatprep.subr.bf16.mxu1 %v898_v0 }
  0x41   :  { %688 = vmatpush3.bf16.msra.mxu0 %v788_v14 }
  0x42   :  { %689 = vmatprep.subr.bf16.mxu0 %v898_v0  ;;  %708 = vmatpush3.bf16.msra.mxu1 %v796_v19 }
  0x43   :  { %709 = vmatprep.subr.bf16.mxu1 %v898_v0 }
  0x45   :  { %690 = vmatpush3.bf16.msra.mxu0 %v789_v16 }
  0x46   :  { %715 = vmatprep.subr.bf16.mxu0 %v898_v0  ;;  %710 = vmatpush3.bf16.msra.mxu1 %v797_v20 }
  0x47   :  { %735 = vmatprep.subr.bf16.mxu1 %v898_v0 }
  0x48   :  { %692 = vmatmul.mubr.bf16.vlgmr.msra.gmra.mrb[0].mxu0 %v44_v18 }
  0x49   :  { %731 = vmatprep.mubr.msk.bf16.mxu0 %vm899_vm0, %v898_v0  ;;  %716 = vmatpush3.bf16.msra.mxu0 %v798_v21 }
  0x4a   :  { %717 = vmatprep.subr.bf16.mxu0 %v898_v0 }
  0x4d   :  { %718 = vmatpush3.bf16.msra.mxu0 %v799_v22 }
  0x4e   :  { %719 = vmatprep.subr.bf16.mxu0 %v898_v0 }
  0x51   :  { %720 = vmatpush3.bf16.msra.mxu0 %v800_v23 }
  0x52   :  { %721 = vmatprep.subr.bf16.mxu0 %v898_v0 }
  0x55   :  { %722 = vmatpush3.bf16.msra.mxu0 %v801_v24 }
  0x56   :  { %723 = vmatprep.subr.bf16.mxu0 %v898_v0 }
  0x59   :  { %724 = vmatpush3.bf16.msra.mxu0 %v802_v25 }
  0x5a   :  { %725 = vmatprep.subr.bf16.mxu0 %v898_v0 }
  0x5d   :  { %726 = vmatpush3.bf16.msra.mxu0 %v803_v26 }
  0x5e   :  { %727 = vmatprep.subr.bf16.mxu0 %v898_v0 }
  0x61   :  { %728 = vmatpush3.bf16.msra.mxu0 %v804_v27 }
  0x62   :  { %729 = vmatprep.subr.bf16.mxu0 %v898_v0 }
  0x65   :  { %730 = vmatpush3.bf16.msra.mxu0 %v805_v34 }
  0x66   :  { %755 = vmatprep.subr.bf16.mxu0 %v898_v0 }
 0x11b   :  { %v143_v28 = vpop.f32.mrb[0].mxu0 }
 0x11c   :  { %v149_v29 = vmax.f32 %v143_v28, 0.0  ;;  %v693_v30 = vpop.f32.mrb[1].mxu0 }
 0x11d   :  { %v146_v31 = vpop.f32.mrb[2].mxu0 }
 0x11e   :  { %v150_v32 = vpack.c.bf16 %v149_v29, %v149_v29  ;;  %v694_v33 = vpop.f32.mrb[3].mxu0 }
 0x120   :  { %712 = vmatmul.mubr.bf16.vlgmr.msra.gmra.mrb[0].mxu1 %v150_v32 }
 0x121   :  { %751 = vmatprep.mubr.msk.bf16.mxu1 %vm899_vm0, %v898_v0  ;;  %736 = vmatpush3.bf16.msra.mxu1 %v806_v35 }
 0x122   :  { %737 = vmatprep.subr.bf16.mxu1 %v898_v0 }
 0x125   :  { %738 = vmatpush3.bf16.msra.mxu1 %v807_v36 }
 0x126   :  { %739 = vmatprep.subr.bf16.mxu1 %v898_v0 }
 0x129   :  { %740 = vmatpush3.bf16.msra.mxu1 %v808_v37 }
 0x12a   :  { %741 = vmatprep.subr.bf16.mxu1 %v898_v0 }
 0x12d   :  { %742 = vmatpush3.bf16.msra.mxu1 %v809_v38 }
 0x12e   :  { %743 = vmatprep.subr.bf16.mxu1 %v898_v0 }
 0x131   :  { %744 = vmatpush3.bf16.msra.mxu1 %v810_v39 }
 0x132   :  { %745 = vmatprep.subr.bf16.mxu1 %v898_v0 }
 0x135   :  { %746 = vmatpush3.bf16.msra.mxu1 %v811_v40 }
 0x136   :  { %747 = vmatprep.subr.bf16.mxu1 %v898_v0 }
 0x139   :  { %748 = vmatpush3.bf16.msra.mxu1 %v812_v41 }
 0x13a   :  { %749 = vmatprep.subr.bf16.mxu1 %v898_v0 }
 0x13d   :  { %750 = vmatpush3.bf16.msra.mxu1 %v813_v48 }
 0x1f3   :  { %v249_v42 = vpop.f32.mrb[0].mxu1 }
 0x1f4   :  { %v255_v43 = vmax.f32 %v249_v42, 0.0  ;;  %v713_v44 = vpop.f32.mrb[1].mxu1 }
 0x1f5   :  { %v252_v45 = vpop.f32.mrb[2].mxu1 }
 0x1f6   :  { %v256_v46 = vpack.c.bf16 %v255_v43, %v255_v43  ;;  %v714_v47 = vpop.f32.mrb[3].mxu1 }
 0x1f8   :  { %732 = vmatmul.mubr.bf16.vlgmr.msra.gmra.mrb[4].mxu0 %v256_v46 }
 0x1f9   :  { %771 = vmatprep.mubr.msk.bf16.mxu0 %vm899_vm0, %v898_v0  ;;  %756 = vmatpush3.bf16.msra.mxu0 %v814_v49 }
 0x1fa   :  { %757 = vmatprep.subr.bf16.mxu0 %v898_v0 }
 0x1fd   :  { %758 = vmatpush3.bf16.msra.mxu0 %v815_v50 }
 0x1fe   :  { %759 = vmatprep.subr.bf16.mxu0 %v898_v0 }
 0x201   :  { %760 = vmatpush3.bf16.msra.mxu0 %v816_v51 }
 0x202   :  { %761 = vmatprep.subr.bf16.mxu0 %v898_v0 }
 0x205   :  { %762 = vmatpush3.bf16.msra.mxu0 %v817_v52 }
 0x206   :  { %763 = vmatprep.subr.bf16.mxu0 %v898_v0 }
 0x209   :  { %764 = vmatpush3.bf16.msra.mxu0 %v818_v53 }
 0x20a   :  { %765 = vmatprep.subr.bf16.mxu0 %v898_v0 }
 0x20d   :  { %766 = vmatpush3.bf16.msra.mxu0 %v819_v54 }
 0x20e   :  { %767 = vmatprep.subr.bf16.mxu0 %v898_v0 }
 0x211   :  { %768 = vmatpush3.bf16.msra.mxu0 %v820_v55 }
 0x212   :  { %769 = vmatprep.subr.bf16.mxu0 %v898_v0 }
 0x215   :  { %770 = vmatpush3.bf16.msra.mxu0 %v821_v62 }
 0x2cb   :  { %v355_v56 = vpop.f32.mrb[4].mxu0 }
 0x2cc   :  { %v361_v57 = vmax.f32 %v355_v56, 0.0  ;;  %v733_v58 = vpop.f32.mrb[5].mxu0 }
 0x2cd   :  { %v358_v59 = vpop.f32.mrb[6].mxu0 }
 0x2ce   :  { %v362_v60 = vpack.c.bf16 %v361_v57, %v361_v57  ;;  %v734_v61 = vpop.f32.mrb[7].mxu0 }
 0x2d0   :  { %752 = vmatmul.mubr.bf16.vlgmr.msra.gmra.mrb[4].mxu1 %v362_v60 }
 0x3a3   :  { %v461_v63 = vpop.f32.mrb[4].mxu1 }
 0x3a4   :  { %v467_v1 = vmax.f32 %v461_v63, 0.0  ;;  %v753_v2 = vpop.f32.mrb[5].mxu1 }
 0x3a5   :  { %v464_v3 = vpop.f32.mrb[6].mxu1 }
 0x3a6   :  { %v468_v4 = vpack.c.bf16 %v467_v1, %v467_v1  ;;  %v754_v5 = vpop.f32.mrb[7].mxu1 }
 0x3a8   :  { %772 = vmatmul.mubr.bf16.vlgmr.msra.gmra.mrb[8].mxu0 %v468_v4 }
 0x47b   :  { %v567_v0 = vpop.f32.mrb[8].mxu0 }
 0x47c   :  { %573 = vst.msk [vmem:[#allocation7] sm:$0xff] %vm40_vm1, %v567_v0  ;;  %v773_v6 = vpop.f32.mrb[9].mxu0 }
 0x47d   :  { %v570_v7 = vpop.f32.mrb[10].mxu0 }
 0x47e   :  { %877 = shalt.err (!%p874_p6)
}
 0x47f   :  { %s878_s10 = scalar_lea.hbm %s1013_s2, 128 }
 0x480   :  { %p879_p7 = scmp.ne.s32.totalorder %s1013_s2, %s878_s10  ;;  %p882_p8 = scmp.lt.u32.totalorder %s878_s10, %s1013_s2 }
 0x482   :  { %p884_p9 = pnand %p882_p8, %p879_p7 }
 0x484   :  { %887 = shalt.err (!%p884_p9)
}
 0x485   :  { %583 = dma.vmem_to_hbm [thread:$0]  %s581_s6, 128, %s1013_s2, [#allocation4]   ;;  %v774_v8 = vpop.f32.mrb[11].mxu0 }
 0x486   :  { %892 = dma.done.wait [#allocation4], 128  }
 0x487   :  { %893 = vsyncadd [#allocation4], 4294967168 }
 0x488   :  { %587 = vsyncpa [#allocation3], 1 }
 0x489   :  { %588 = vsyncpa [#allocation6], 1 }
 0x48a   :  { %589 = vsyncpa [#allocation4], 1 }

</bundles_post_ra>
